<compile_context>
chip_gen: v6e
topology: v6e:2x2x1
jax: 0.10.0
libtpu: 0.0.40
codegen_flags: <defaults>
</compile_context>

<pallas_src>
import functools

import jax
import jax.numpy as jnp
from jax.experimental import pallas as pl
from jax.experimental.pallas import tpu as pltpu


# ----------------------------------------------------------------------------
# VMEM budget / class-block sizing helpers
# ----------------------------------------------------------------------------
def _vmem_budget_bytes(frac=0.25, lo=4 << 20, hi=24 << 20, fallback=12 << 20):
    """Per-step VMEM budget derived from the actual chip (fallback if unknown)."""
    try:
        info = pltpu.get_tpu_info()
        cap = getattr(info, "vmem_capacity_bytes", None)
        budget = int(cap * frac) if cap else fallback
    except Exception:  # interpret mode / older jax: stay conservative
        budget = fallback
    return max(lo, min(hi, budget))


def _largest_divisor_at_most(n, cap):
    cap = max(1, min(n, cap))
    for d in range(cap, 0, -1):
        if n % d == 0:
            return d
    return 1


# ----------------------------------------------------------------------------
# Init-time: build the prompt template (prefix rows + zero ctx slab + suffix).
# In the nn.Module this corresponds to the registered buffers and is built
# ONCE in __init__, not per forward call.
# ----------------------------------------------------------------------------
def make_coop_prompt_template(prefix, suffix, n_ctx, out_dtype=None):
    n_cls, one, d = prefix.shape
    assert one == 1, prefix.shape
    assert suffix.shape[0] == n_cls and suffix.shape[2] == d, suffix.shape
    if out_dtype is None:
        out_dtype = jnp.result_type(prefix.dtype, suffix.dtype)
    ctx_slab = jnp.zeros((n_cls, n_ctx, d), out_dtype)
    return jnp.concatenate(
        [prefix.astype(out_dtype), ctx_slab, suffix.astype(out_dtype)], axis=1)


# ----------------------------------------------------------------------------
# Per-call Pallas kernel: write ctx rows into the (aliased) template.
# ----------------------------------------------------------------------------
def _ctx_write_kernel(tmpl_ref, ctx_ref, out_ref, *scratch,
                      bc, n_ctx, ctx_is_csc, use_stage):
    # tmpl_ref : (n_cls, L, D) HBM ref, aliased to out_ref -- never read.
    # ctx_ref  : (bc, n_ctx, D) VMEM block (csc) or (n_ctx, D) VMEM (generic)
    # out_ref  : (n_cls, L, D) HBM ref (same buffer as tmpl_ref)
    del tmpl_ref
    if use_stage:
        stage_ref, sem = scratch
        if ctx_is_csc:
            stage_ref[...] = ctx_ref[...].astype(stage_ref.dtype)
        else:
            # one broadcast, one block store (JAX does not CSE broadcast_in_dim)
            stage_ref[...] = jnp.broadcast_to(
                ctx_ref[...].astype(stage_ref.dtype)[None], stage_ref.shape)
        src = stage_ref
    else:
        (sem,) = scratch
        src = ctx_ref  # csc ctx already in output dtype: DMA straight from block

    cls0 = pl.multiple_of(pl.program_id(0) * bc, bc)
    copy = pltpu.make_async_copy(
        src,
        out_ref.at[pl.ds(cls0, bc), pl.ds(1, n_ctx), :],
        sem)
    copy.start()
    copy.wait()


def coop_write_ctx(template, ctx, *, class_block=None, vmem_budget_bytes=None):
    """Write ctx into the ctx slab of `template`, returning the full prompts.

    template : (n_cls, L, D) built by make_coop_prompt_template (cached buffer)
    ctx      : (n_ctx, D) generic or (n_cls, n_ctx, D) class-specific context
    Returns  : (n_cls, L, D) prompts (prefix/suffix rows carried over unchanged,
               so the result can be reused as the template for the next call).
    """
    n_cls, seq_len, d = template.shape
    ctx_is_csc = (ctx.ndim == 3)
    if ctx_is_csc:
        assert ctx.shape[0] == n_cls, ctx.shape
    assert ctx.shape[-1] == d, ctx.shape
    n_ctx = ctx.shape[-2]
    assert 1 + n_ctx <= seq_len, (n_ctx, seq_len)

    out_dtype = template.dtype
    use_stage = (not ctx_is_csc) or (ctx.dtype != out_dtype)

    if vmem_budget_bytes is None:
        vmem_budget_bytes = _vmem_budget_bytes()

    ctx_isz = jnp.dtype(ctx.dtype).itemsize
    out_isz = jnp.dtype(out_dtype).itemsize

    # Per-step VMEM footprint: double-buffered csc ctx block + optional stage.
    per_class = n_ctx * d * ((2 * ctx_isz if ctx_is_csc else 0)
                             + (out_isz if use_stage else 0))
    fixed = 0 if ctx_is_csc else 2 * n_ctx * d * ctx_isz  # generic ctx buffers
    per_class = max(per_class, 1)
    max_bc = max(1, (vmem_budget_bytes - fixed) // per_class)
    if class_block is not None:
        max_bc = min(max_bc, int(class_block))
    bc = _largest_divisor_at_most(n_cls, max_bc)   # no padding, no output slice
    n_blocks = n_cls // bc

    if ctx_is_csc:
        ctx_spec = pl.BlockSpec((bc, n_ctx, d), lambda i: (i, 0, 0))
    else:
        ctx_spec = pl.BlockSpec((n_ctx, d), lambda i: (0, 0))

    scratch_shapes = []
    if use_stage:
        scratch_shapes.append(pltpu.VMEM((bc, n_ctx, d), out_dtype))
    scratch_shapes.append(pltpu.SemaphoreType.DMA)

    kernel = functools.partial(_ctx_write_kernel, bc=bc, n_ctx=n_ctx,
                               ctx_is_csc=ctx_is_csc, use_stage=use_stage)

    bytes_accessed = ctx.size * ctx_isz + n_cls * n_ctx * d * out_isz
    vmem_limit = int(min(32 << 20, max(8 << 20, 4 * (fixed + bc * per_class))))

    return pl.pallas_call(
        kernel,
        out_shape=jax.ShapeDtypeStruct((n_cls, seq_len, d), out_dtype),
        grid=(n_blocks,),
        in_specs=[
            pl.BlockSpec(memory_space=pl.ANY),   # template (aliased, never read)
            ctx_spec,                            # ctx
        ],
        out_specs=pl.BlockSpec(memory_space=pl.ANY),
        scratch_shapes=scratch_shapes,
        input_output_aliases={0: 0},             # output reuses the template buffer
        compiler_params=pltpu.CompilerParams(
            dimension_semantics=("parallel",),
            vmem_limit_bytes=vmem_limit),
        cost_estimate=pl.CostEstimate(
            flops=0, transcendentals=0, bytes_accessed=bytes_accessed),
    )(template, ctx)


# ----------------------------------------------------------------------------
# Convenience forward mirroring the module signature (prefix, ctx, suffix).
# ----------------------------------------------------------------------------
def coop_prompt_learner_forward(prefix, ctx, suffix, *,
                                class_token_position="end", class_block=None):
    if class_token_position != "end":
        # TODO(synk): 'middle'/'front' need per-class name_len-dependent dynamic
        # slicing (scalar prefetch + pl.ds writes); only 'end' is implemented.
        raise NotImplementedError("only class_token_position='end' is implemented")
    n_ctx = ctx.shape[-2]
    out_dtype = jnp.result_type(prefix.dtype, ctx.dtype, suffix.dtype)
    # NOTE: in the module, prefix/suffix are fixed buffers -> this template is
    # built once at init and cached; only coop_write_ctx runs per forward call.
    template = make_coop_prompt_template(prefix, suffix, n_ctx, out_dtype)
    return coop_write_ctx(template, ctx, class_block=class_block)


def reference_forward(prefix, ctx, suffix):
    """Pure-JAX reference mirroring the PyTorch forward ('end' position)."""
    n_cls = prefix.shape[0]
    if ctx.ndim == 2:
        ctx = jnp.broadcast_to(ctx[None], (n_cls,) + ctx.shape)
    out_dtype = jnp.result_type(prefix.dtype, ctx.dtype, suffix.dtype)
    return jnp.concatenate([prefix.astype(out_dtype), ctx.astype(out_dtype),
                            suffix.astype(out_dtype)], axis=1)


if __name__ == "__main__":
    # Small, CLIP-like synthetic shapes.
    n_cls = 4          # number of class names
    n_ctx = 4          # learnable context tokens ("X X X X")
    ctx_dim = 128      # ln_final.weight.shape[0]
    seq_len = 16       # tokenized prompt length (stand-in for CLIP's 77)
    n_suffix = seq_len - 1 - n_ctx
    dtype = jnp.float32

    key = jax.random.PRNGKey(0)
    k_ctx, k_csc, k_pre, k_suf, k_ctx2 = jax.random.split(key, 5)

    # nn.init.normal_(ctx_vectors, std=0.02)
    ctx_generic = (0.02 * jax.random.normal(k_ctx, (n_ctx, ctx_dim))).astype(dtype)
    ctx_csc = (0.02 * jax.random.normal(k_csc, (n_cls, n_ctx, ctx_dim))).astype(dtype)
    # token_embedding outputs (synthetic): SOS slice and class-name/EOS slice.
    token_prefix = jax.random.normal(k_pre, (n_cls, 1, ctx_dim)).astype(dtype)
    token_suffix = jax.random.normal(k_suf, (n_cls, n_suffix, ctx_dim)).astype(dtype)

    # 1) generic context (csc=False), one-shot convenience wrapper
    prompts = coop_prompt_learner_forward(token_prefix, ctx_generic, token_suffix)
    prompts = jax.block_until_ready(prompts)
    expected = reference_forward(token_prefix, ctx_generic, token_suffix)
    assert prompts.shape == (n_cls, seq_len, ctx_dim), prompts.shape
    assert jnp.allclose(prompts, expected), "mismatch vs reference (generic ctx)"

    # 2) class-specific context (csc=True) -- direct-DMA path (no staging/cast)
    prompts_csc = coop_prompt_learner_forward(token_prefix, ctx_csc, token_suffix)
    prompts_csc = jax.block_until_ready(prompts_csc)
    expected_csc = reference_forward(token_prefix, ctx_csc, token_suffix)
    assert jnp.allclose(prompts_csc, expected_csc), "mismatch vs reference (csc ctx)"

    # 3) cached-template pattern: build once, reuse the returned prompts as the
    #    template for the next step (prefix/suffix rows are never clobbered).
    template = make_coop_prompt_template(token_prefix, token_suffix, n_ctx, dtype)
    p1 = coop_write_ctx(template, ctx_generic)
    ctx_generic2 = (0.02 * jax.random.normal(k_ctx2, (n_ctx, ctx_dim))).astype(dtype)
    p2 = coop_write_ctx(p1, ctx_generic2)      # previous output as next template
    p2 = jax.block_until_ready(p2)
    assert jnp.allclose(p1, expected), "mismatch vs reference (template step 1)"
    assert jnp.allclose(p2, reference_forward(token_prefix, ctx_generic2, token_suffix)), \
        "mismatch vs reference (template step 2)"

    # 4) multi-block grid (class_block=2 -> 2 grid steps) + dtype-promotion path
    ctx_csc_bf16 = ctx_csc.astype(jnp.bfloat16)
    prompts_blk = coop_prompt_learner_forward(token_prefix, ctx_csc_bf16,
                                              token_suffix, class_block=2)
    prompts_blk = jax.block_until_ready(prompts_blk)
    expected_blk = reference_forward(token_prefix, ctx_csc_bf16, token_suffix)
    assert jnp.allclose(prompts_blk, expected_blk), "mismatch vs reference (bf16 blocks)"

    print("KERNEL_OK")
</pallas_src>

<mosaic_0001>
module attributes {stable_mosaic.version = 11 : i64} {
  func.func @_ctx_write_kernel(%arg0: i32, %arg1: memref<4x16x128xf32, #tpu.memory_space<any>>, %arg2: memref<4x128xf32, #tpu.memory_space<vmem>>, %arg3: memref<4x16x128xf32, #tpu.memory_space<any>>, %arg4: memref<4x4x128xf32, #tpu.memory_space<vmem>>, %arg5: memref<!tpu.dma_semaphore, #tpu.memory_space<semaphore_mem>>) attributes {dimension_semantics = [#tpu.dimension_semantics<parallel>], iteration_bounds = array<i64: 1>, scalar_prefetch = 0 : i64, scratch_operands = 2 : i64, tpu.core_type = #tpu.core_type<tc>, window_params = [{}, {pipeline_mode = #tpu.pipeline_mode<synchronous>, transform_indices = @transform_1, window_bounds = array<i64: 4, 128>}, {}]} {
    %c0 = arith.constant 0 : index
    %c0_0 = arith.constant 0 : index
    %0 = vector.load %arg2[%c0, %c0_0] : memref<4x128xf32, #tpu.memory_space<vmem>>, vector<4x128xf32>
    %1 = vector.shape_cast %0 : vector<4x128xf32> to vector<1x4x128xf32>
    %2 = vector.shape_cast %1 : vector<1x4x128xf32> to vector<1x4x128xf32>
    %3 = vector.broadcast %2 : vector<1x4x128xf32> to vector<4x4x128xf32>
    %c0_1 = arith.constant 0 : index
    %c0_2 = arith.constant 0 : index
    %c0_3 = arith.constant 0 : index
    %4 = vector.load %arg4[%c0_1, %c0_2, %c0_3] : memref<4x4x128xf32, #tpu.memory_space<vmem>>, vector<4x4x128xf32>
    tpu.vector_store %arg4[%c0_1, %c0_2, %c0_3], %3 {strides = array<i32>} : memref<4x4x128xf32, #tpu.memory_space<vmem>>, vector<4x4x128xf32>,
    %c4_i32 = arith.constant 4 : i32
    %5 = arith.muli %arg0, %c4_i32 : i32
    %6 = tpu.assume_multiple %5, 4 : i32
    %c1_i32 = arith.constant 1 : i32
    %c0_i32 = arith.constant 0 : i32
    %7 = tpu.memref_slice %arg3[%6, %c1_i32, %c0_i32] : memref<4x16x128xf32, #tpu.memory_space<any>> -> memref<4x4x128xf32, #tpu.memory_space<any>>
    tpu.enqueue_dma source(%arg4 : memref<4x4x128xf32, #tpu.memory_space<vmem>>) target(%7 : memref<4x4x128xf32, #tpu.memory_space<any>>) target_semaphore(%arg5 : memref<!tpu.dma_semaphore, #tpu.memory_space<semaphore_mem>>)
    %c1_i32_4 = arith.constant 1 : i32
    %c0_i32_5 = arith.constant 0 : i32
    %8 = tpu.memref_slice %arg3[%6, %c1_i32_4, %c0_i32_5] : memref<4x16x128xf32, #tpu.memory_space<any>> -> memref<4x4x128xf32, #tpu.memory_space<any>>
    tpu.wait_dma2 semaphore(%arg5 : memref<!tpu.dma_semaphore, #tpu.memory_space<semaphore_mem>>) src(%arg4 : memref<4x4x128xf32, #tpu.memory_space<vmem>>) dst(%8 : memref<4x4x128xf32, #tpu.memory_space<any>>)
    return
  }
  func.func @transform_1(%arg0: i32) -> (i32, i32) {
    %c0_i32 = arith.constant 0 : i32
    %c0_i32_0 = arith.constant 0 : i32
    %c0_i32_1 = arith.constant 0 : i32
    return %c0_i32, %c0_i32_0 : i32, i32
  }
}

</mosaic_0001>

<bundles_post_ra>
// kernel: tpu_custom_call.1
= control target key start
LH: loop header
LB: loop body
LE: loop exit
PB: predicated region body
PF: predicated region fallthrough
CT: control target
= control target key end

     0   :  { %s65_s14 = smov [#allocation2]   ;;  %s90_s0 = inlined_call_operand.hbm [shape: f32[4,16,128], index: 0, kind: input, shape index: {}, may-alias: {0,2}]   ;;  %s91_s1 = inlined_call_operand.vmem [shape: f32[4,128], index: 1, kind: input, shape index: {}]   ;;  %s92_s2 = inlined_call_operand.hbm [shape: f32[4,16,128], index: 2, kind: output, shape index: {}, may-alias: {0,2}]  }
   0x1   :  { %v9_v0 = vld [vmem:[%s91_s1] sm:$0xf]  ;;  %s34_s13 = scalar_lea.hbm %s92_s2, 16  ;;  %s20_s15 = sshll.u32 %s65_s14, 4  ;;  %s21_s15 = int_to_ptr.vmem [resolvable:$true] %s20_s15 }
   0x2   :  { %10 = vst [vmem:[#allocation2] sm:$0xf] %v9_v0  ;;  %11 = vst [vmem:[#allocation2 + $0x4] sm:$0xf] %v9_v0  ;;  %s40_s0 = scalar_lea.vmem %s21_s15, 256  ;;  %p45_p1 = scmp.lt.s32.totalorder %s21_s15, %s21_s15 }
   0x3   :  { %12 = vst [vmem:[#allocation2 + $0x8] sm:$0xf] %v9_v0  ;;  %13 = vst [vmem:[#allocation2 + $0xc] sm:$0xf] %v9_v0  ;;  %p41_p0 = scmp.ne.s32.totalorder %s21_s15, %s40_s0  ;;  %p46_p2 = scmp.lt.s32.totalorder %s40_s0, %s40_s0 }
   0x5   :  { %p47_p3 = por %p46_p2, %p45_p1 }
   0x7   :  { %p48_p4 = pnand %p47_p3, %p41_p0 }
   0x9   :  { %51 = shalt.err (!%p48_p4)  }
   0xa   :  { %s66_s16 = smov 64   ;;  %s67_s1 = smov 256  }
   0xb   :  { %s68_s17 = smov 4  }
   0xc   :  { %23 = dma.vmem_to_hbm [thread:$0]  %s21_s15, 256, %s34_s13, [#allocation3], %s66_s16, %s67_s1, %s68_s17 }
   0xd   :  { %63 = dma.done.wait [#allocation3], 256 }
   0xe   :  { %64 = vsyncadd [#allocation3], 4294967040 }
   0xf   :  { %28 = vsyncmov [#allocation3] }
  0x12   :  { %s29_s2 = vpop.sfrf %28 }
  0x13   :  { %p35_p5 = scmp.ne.s32.totalorder %s29_s2, 0 }
  0x15   :  { %33 = shalt.err (%p35_p5)  }

</bundles_post_ra>
